<compile_context>
chip_gen: v6e
topology: v6e:2x2x1
jax: 0.10.0
libtpu: 0.0.40
codegen_flags: <defaults>
</compile_context>

<pallas_src>
import numpy as np

import jax
import jax.numpy as jnp
from jax.experimental import pallas as pl
from jax.experimental.pallas import tpu as pltpu


def _build_weights(lookback_len, out_len, kernel_size):
    """Trace-time (Lb, out_len) matrices such that, for a row x of length Lb:
         mean = x @ Wm   (replicate-padded AvgPool1d(kernel, stride=1), zero tail)
         res  = x @ Wr   (Wr = [I | 0] - Wm, zero tail)
    Columns t >= Lb stay zero, which realizes F.pad(..., (0, pred_len))."""
    pad = (kernel_size - 1) // 2
    inv = 1.0 / kernel_size
    wm = np.zeros((lookback_len, out_len), np.float32)
    for t in range(lookback_len):
        for j in range(t - pad, t - pad + kernel_size):
            s = min(max(j, 0), lookback_len - 1)
            wm[s, t] += inv
    wr = -wm
    wr[np.arange(lookback_len), np.arange(lookback_len)] += 1.0
    return wm, wr


def _pick_row_block(rows, per_row_bytes, budget_bytes=10 << 20, min_steps=4):
    """Largest row-block that (a) divides `rows`, (b) is a multiple of 8
    (sublane granularity) or equals `rows`, (c) keeps the double-buffered tile
    under `budget_bytes`, and (d) leaves >= `min_steps` grid steps when the
    problem is big enough (DMA/compute overlap on single-core v5e/v6e and
    >=2 steps per TensorCore on v7x megacore)."""
    if rows % 8 != 0:
        return rows  # block must equal the full dim in this case
    cap = (budget_bytes // max(2 * per_row_bytes, 1)) // 8 * 8
    cap = max(8, min(rows, cap))
    target = (rows // min_steps) // 8 * 8
    if target >= 8:
        cap = min(cap, target)
    best = 8
    for bm in range(8, cap + 1, 8):
        if rows % bm == 0:
            best = bm
    return best


def _decomp_kernel(wr_ref, wm_ref, x_ref, res_ref, mean_ref):
    """One row-block of the decomposition.

    wr_ref, wm_ref: (Lb, out_len)  residual / trend matrices (input dtype)
    x_ref:          (bm, Lb)       lookback rows (B*K blocked on sublanes)
    res_ref/mean_ref: (bm, out_len) outputs, single full-block store each.
    """
    x = x_ref[...]
    res = jnp.dot(x, wr_ref[...], preferred_element_type=jnp.float32)
    mean = jnp.dot(x, wm_ref[...], preferred_element_type=jnp.float32)
    res_ref[...] = res.astype(res_ref.dtype)
    mean_ref[...] = mean.astype(mean_ref.dtype)


def csdi_series_decomp(x, lookback_len, pred_len, kernel_size=25):
    """x: (B, K, L) -> (res, moving_mean), each (B, K, lookback_len + pred_len)."""
    B, K, L = x.shape
    Lb = lookback_len
    out_len = Lb + pred_len
    assert L >= Lb
    # Even kernel_size would change the AvgPool1d output length and silently
    # misalign vs. the PyTorch module.
    assert kernel_size % 2 == 1, "kernel_size must be odd"

    rows = B * K
    need_slice = L != Lb
    x2 = (x[:, :, :Lb] if need_slice else x).reshape(rows, Lb)

    wm_np, wr_np = _build_weights(Lb, out_len, kernel_size)
    # Keep MXU operands in bf16 when the input is bf16 (native MXU rate, half
    # the VMEM/vreg pressure); accumulation stays f32 via preferred_element_type.
    w_dtype = jnp.bfloat16 if x.dtype == jnp.bfloat16 else jnp.float32
    wm = jnp.asarray(wm_np, w_dtype)
    wr = jnp.asarray(wr_np, w_dtype)

    itemsize = jnp.dtype(x.dtype).itemsize
    per_row_bytes = (Lb + 2 * out_len) * itemsize      # x row + both output rows
    bm = _pick_row_block(rows, per_row_bytes)
    grid_rows = rows // bm

    # VMEM limit sized to the real double-buffered footprint (x + both outputs
    # + both weight matrices), with 2x margin for compiler scratch; capped at a
    # level that is safe on v7x (64 MiB physical per TensorCore).
    w_bytes = 2 * Lb * out_len * jnp.dtype(w_dtype).itemsize
    est = 2 * (w_bytes + bm * per_row_bytes)
    vmem_limit = int(min(32 << 20, max(2 * est, 16 << 20)))

    compiler_params = pltpu.CompilerParams(
        dimension_semantics=("parallel",),
        vmem_limit_bytes=vmem_limit,
        # Let XLA fuse the lookback slice into the kernel's input so the unused
        # time tail is never materialized / re-read.
        allow_input_fusion=[False, False, True] if need_slice else None,
    )

    res2, mean2 = pl.pallas_call(
        _decomp_kernel,
        out_shape=(
            jax.ShapeDtypeStruct((rows, out_len), x.dtype),
            jax.ShapeDtypeStruct((rows, out_len), x.dtype),
        ),
        grid_spec=pltpu.PrefetchScalarGridSpec(
            num_scalar_prefetch=0,
            grid=(grid_rows,),
            in_specs=[
                pl.BlockSpec((Lb, out_len), lambda i: (0, 0)),   # Wr, resident
                pl.BlockSpec((Lb, out_len), lambda i: (0, 0)),   # Wm, resident
                pl.BlockSpec((bm, Lb), lambda i: (i, 0)),        # x row-block
            ],
            out_specs=(
                pl.BlockSpec((bm, out_len), lambda i: (i, 0)),
                pl.BlockSpec((bm, out_len), lambda i: (i, 0)),
            ),
        ),
        compiler_params=compiler_params,
    )(wr, wm, x2)

    # Free row-major reshapes back to the caller-visible (B, K, out_len) layout.
    return res2.reshape(B, K, out_len), mean2.reshape(B, K, out_len)


def _reference(x, lookback_len, pred_len, kernel_size=25):
    """Pure-JAX reference reproducing the PyTorch forward."""
    pad = (kernel_size - 1) // 2
    xt = jnp.transpose(x, (0, 2, 1))[:, :lookback_len, :]          # (B, Lb, K)
    front = jnp.repeat(xt[:, 0:1, :], pad, axis=1)
    end = jnp.repeat(xt[:, -1:, :], pad, axis=1)
    padded = jnp.concatenate([front, xt, end], axis=1)             # (B, Lb+2p, K)
    windows = jnp.stack(
        [padded[:, d:d + lookback_len, :] for d in range(kernel_size)], axis=0)
    mean = jnp.mean(windows, axis=0)                               # (B, Lb, K)
    res = xt - mean
    mean = jnp.transpose(mean, (0, 2, 1))
    res = jnp.transpose(res, (0, 2, 1))
    zpad = [(0, 0), (0, 0), (0, pred_len)]
    return jnp.pad(res, zpad), jnp.pad(mean, zpad)


if __name__ == "__main__":
    B, K, L = 2, 8, 40          # batch, features, time (L > lookback on purpose)
    lookback_len, pred_len, kernel_size = 32, 8, 25

    key = jax.random.PRNGKey(0)
    x = jax.random.normal(key, (B, K, L), dtype=jnp.float32)

    res, mean = csdi_series_decomp(x, lookback_len, pred_len, kernel_size)
    res, mean = jax.block_until_ready((res, mean))

    res_ref, mean_ref = _reference(x, lookback_len, pred_len, kernel_size)
    assert res.shape == (B, K, lookback_len + pred_len)
    assert mean.shape == (B, K, lookback_len + pred_len)
    assert jnp.allclose(res, res_ref, atol=1e-5, rtol=1e-5)
    assert jnp.allclose(mean, mean_ref, atol=1e-5, rtol=1e-5)

    print("KERNEL_OK")
</pallas_src>

<mosaic_0001>
module attributes {stable_mosaic.version = 11 : i64} {
  func.func @_decomp_kernel(%arg0: i32, %arg1: memref<32x40xf32, #tpu.memory_space<vmem>>, %arg2: memref<32x40xf32, #tpu.memory_space<vmem>>, %arg3: memref<16x32xf32, #tpu.memory_space<vmem>>, %arg4: memref<16x40xf32, #tpu.memory_space<vmem>>, %arg5: memref<16x40xf32, #tpu.memory_space<vmem>>) attributes {dimension_semantics = [#tpu.dimension_semantics<parallel>], iteration_bounds = array<i64: 1>, scalar_prefetch = 0 : i64, scratch_operands = 0 : i64, tpu.core_type = #tpu.core_type<tc>, window_params = [{pipeline_mode = #tpu.pipeline_mode<synchronous>, transform_indices = @transform_0, window_bounds = array<i64: 32, 40>}, {pipeline_mode = #tpu.pipeline_mode<synchronous>, transform_indices = @transform_1, window_bounds = array<i64: 32, 40>}, {transform_indices = @transform_2, window_bounds = array<i64: 16, 32>}, {transform_indices = @transform_3, window_bounds = array<i64: 16, 40>}, {transform_indices = @transform_4, window_bounds = array<i64: 16, 40>}]} {
    %c0 = arith.constant 0 : index
    %c0_0 = arith.constant 0 : index
    %0 = vector.load %arg3[%c0, %c0_0] : memref<16x32xf32, #tpu.memory_space<vmem>>, vector<16x32xf32>
    %c0_1 = arith.constant 0 : index
    %c0_2 = arith.constant 0 : index
    %1 = vector.load %arg1[%c0_1, %c0_2] : memref<32x40xf32, #tpu.memory_space<vmem>>, vector<32x40xf32>
    %cst = arith.constant dense<0.000000e+00> : vector<16x40xf32>
    %2 = tpu.matmul %0, %1, %cst {dimension_numbers = #tpu.dot_dimension_numbers<[1], [0], [0], [1], [0, 0, 1, 1], [], []>} : vector<16x32xf32>, vector<32x40xf32>, vector<16x40xf32> -> vector<16x40xf32>
    %c0_3 = arith.constant 0 : index
    %c0_4 = arith.constant 0 : index
    %3 = vector.load %arg2[%c0_3, %c0_4] : memref<32x40xf32, #tpu.memory_space<vmem>>, vector<32x40xf32>
    %cst_5 = arith.constant dense<0.000000e+00> : vector<16x40xf32>
    %4 = tpu.matmul %0, %3, %cst_5 {dimension_numbers = #tpu.dot_dimension_numbers<[1], [0], [0], [1], [0, 0, 1, 1], [], []>} : vector<16x32xf32>, vector<32x40xf32>, vector<16x40xf32> -> vector<16x40xf32>
    %c0_6 = arith.constant 0 : index
    %c0_7 = arith.constant 0 : index
    %5 = vector.load %arg4[%c0_6, %c0_7] : memref<16x40xf32, #tpu.memory_space<vmem>>, vector<16x40xf32>
    tpu.vector_store %arg4[%c0_6, %c0_7], %2 {strides = array<i32>} : memref<16x40xf32, #tpu.memory_space<vmem>>, vector<16x40xf32>,
    %c0_8 = arith.constant 0 : index
    %c0_9 = arith.constant 0 : index
    %6 = vector.load %arg5[%c0_8, %c0_9] : memref<16x40xf32, #tpu.memory_space<vmem>>, vector<16x40xf32>
    tpu.vector_store %arg5[%c0_8, %c0_9], %4 {strides = array<i32>} : memref<16x40xf32, #tpu.memory_space<vmem>>, vector<16x40xf32>,
    return
  }
  func.func @transform_0(%arg0: i32) -> (i32, i32) {
    %c0_i32 = arith.constant 0 : i32
    %c0_i32_0 = arith.constant 0 : i32
    %c0_i32_1 = arith.constant 0 : i32
    return %c0_i32, %c0_i32_0 : i32, i32
  }
  func.func @transform_1(%arg0: i32) -> (i32, i32) {
    %c0_i32 = arith.constant 0 : i32
    %c0_i32_0 = arith.constant 0 : i32
    %c0_i32_1 = arith.constant 0 : i32
    return %c0_i32, %c0_i32_0 : i32, i32
  }
  func.func @transform_2(%arg0: i32) -> (i32, i32) {
    %c0_i32 = arith.constant 0 : i32
    %c0_i32_0 = arith.constant 0 : i32
    return %arg0, %c0_i32 : i32, i32
  }
  func.func @transform_3(%arg0: i32) -> (i32, i32) {
    %c0_i32 = arith.constant 0 : i32
    %c0_i32_0 = arith.constant 0 : i32
    return %arg0, %c0_i32 : i32, i32
  }
  func.func @transform_4(%arg0: i32) -> (i32, i32) {
    %c0_i32 = arith.constant 0 : i32
    %c0_i32_0 = arith.constant 0 : i32
    return %arg0, %c0_i32 : i32, i32
  }
}

</mosaic_0001>

<bundles_post_ra>
// kernel: tpu_custom_call.1
= control target key start
LH: loop header
LB: loop body
LE: loop exit
PB: predicated region body
PF: predicated region fallthrough
CT: control target
= control target key end

     0   :  { %10 = vsyncpa [#allocation3], 0  ;;  %s480_s0 = inlined_call_operand.hbm [shape: f32[32,40], index: 0, kind: input, shape index: {}]   ;;  %s481_s1 = inlined_call_operand.hbm [shape: f32[32,40], index: 1, kind: input, shape index: {}]   ;;  %s482_s2 = inlined_call_operand.hbm [shape: f32[16,32], index: 2, kind: input, shape index: {}]   ;;  %s483_s3 = inlined_call_operand.hbm [shape: f32[16,40], index: 3, kind: output, shape index: {0}]   ;;  %s484_s4 = inlined_call_operand.hbm [shape: f32[16,40], index: 4, kind: output, shape index: {1}]  }
   0x1   :  { %11 = vsyncpa [#allocation6], 0 }
   0x2   :  { %12 = vsyncpa [#allocation4], 0 }
   0x3   :  { %13 = vsyncpa [#allocation10], 0  ;;  %s418_s15 = smov [#allocation5]   ;;  %s419_s17 = smov [#allocation2]  }
   0x4   :  { %s31_s16 = sshll.u32 %s418_s15, 4  ;;  %s19_s18 = sshll.u32 %s419_s17, 4  ;;  %s32_s16 = int_to_ptr.vmem [resolvable:$true] %s31_s16  ;;  %s20_s18 = int_to_ptr.vmem [resolvable:$true] %s19_s18 }
   0x5   :  { %s318_s19 = scalar_lea.vmem %s32_s16, 512  ;;  %p323_p1 = scmp.lt.s32.totalorder %s32_s16, %s32_s16 }
   0x6   :  { %p319_p0 = scmp.ne.s32.totalorder %s32_s16, %s318_s19  ;;  %p324_p2 = scmp.lt.s32.totalorder %s318_s19, %s318_s19 }
   0x8   :  { %p325_p3 = por %p324_p2, %p323_p1 }
   0xa   :  { %p326_p4 = pnand %p325_p3, %p319_p0 }
   0xc   :  { %329 = shalt.err (!%p326_p4)
}
   0xd   :  { %s420_s20 = smov 128   ;;  %s421_s21 = smov 8  }
   0xe   :  { %37 = dma.hbm_to_vmem [thread:$0]  %s481_s1, 512, %s32_s16, [#allocation6], %s420_s20, %s420_s20, %s421_s21  }
   0xf   :  { %s338_s24 = scalar_lea.vmem %s20_s18, 512  ;;  %p343_p6 = scmp.lt.s32.totalorder %s20_s18, %s20_s18 }
  0x10   :  { %p339_p5 = scmp.ne.s32.totalorder %s20_s18, %s338_s24  ;;  %p344_p7 = scmp.lt.s32.totalorder %s338_s24, %s338_s24 }
  0x12   :  { %p345_p8 = por %p344_p7, %p343_p6 }
  0x14   :  { %p346_p9 = pnand %p345_p8, %p339_p5 }
  0x16   :  { %349 = shalt.err (!%p346_p9)
}
  0x17   :  { %25 = dma.hbm_to_vmem [thread:$0]  %s480_s0, 512, %s20_s18, [#allocation3], %s420_s20, %s420_s20, %s421_s21  }
  0x18   :  { %s422_s27 = smov [#allocation7]  }
  0x19   :  { %s43_s28 = sshll.u32 %s422_s27, 4  ;;  %s44_s28 = int_to_ptr.vmem [resolvable:$true] %s43_s28 }
  0x1a   :  { %s358_s29 = scalar_lea.vmem %s44_s28, 256  ;;  %p363_p11 = scmp.lt.s32.totalorder %s44_s28, %s44_s28 }
  0x1b   :  { %p359_p10 = scmp.ne.s32.totalorder %s44_s28, %s358_s29  ;;  %p364_p12 = scmp.lt.s32.totalorder %s358_s29, %s358_s29 }
  0x1d   :  { %p365_p13 = por %p364_p12, %p363_p11 }
  0x1f   :  { %p366_p0 = pnand %p365_p13, %p359_p10 }
  0x21   :  { %369 = shalt.err (!%p366_p0)
}
  0x22   :  { %49 = dma.hbm_to_vmem [thread:$0]  %s482_s2, 256, %s44_s28, [#allocation6], %s420_s20, %s420_s20, %s421_s21  }
  0x23   :  { %410 = dma.done.wait [#allocation3], 512  }
  0x24   :  { %411 = vsyncadd [#allocation3], 4294966784 }
  0x25   :  { %412 = dma.done.wait [#allocation6], 768  }
  0x26   :  { %413 = vsyncadd [#allocation6], 4294966528  ;;  %v64_v0 = vld [vmem:[#allocation2 + $0x18] sm:$0xff]  ;;  %v63_v2 = vld [vmem:[#allocation2 + $0x10] sm:$0xff]  ;;  %vm65_vm0 = vcmask 261120   ;;  %vm226_vm1 = vcmask 326656  }
  0x27   :  { %v150_v1 = vld [vmem:[#allocation5 + $0x18] sm:$0xff]  ;;  %281 = vmatprep.subr.mxu0 %v64_v0  ;;  %v149_v3 = vld [vmem:[#allocation5 + $0x10] sm:$0xff]  ;;  %v62_v4 = vld [vmem:[#allocation2 + $0x8] sm:$0xff]  ;;  %s423_s0 = smov [#allocation8]   ;;  %s424_s5 = smov [#allocation9]  }
  0x28   :  { %292 = vmatprep.subr.mxu1 %v150_v1  ;;  %282 = vmatpush3.msra.mxu0 %v64_v0  ;;  %v148_v5 = vld [vmem:[#allocation5 + $0x8] sm:$0xff]  ;;  %v61_v6 = vld [vmem:[#allocation2] sm:$0xff]  ;;  %s236_s2 = sshll.u32 %s423_s0, 4  ;;  %s248_s6 = sshll.u32 %s424_s5, 4  ;;  %s237_s2 = int_to_ptr.vmem [resolvable:$true] %s236_s2  ;;  %s249_s6 = int_to_ptr.vmem [resolvable:$true] %s248_s6 }
  0x29   :  { %293 = vmatpush3.msra.mxu1 %v150_v1  ;;  %283 = vmatprep.subr.mxu0 %v63_v2  ;;  %v147_v7 = vld [vmem:[#allocation5] sm:$0xff]  ;;  %v60_v9 = vld [vmem:[#allocation7 + $0x8] sm:$0xff]  ;;  %s370_s7 = scalar_lea.vmem %s237_s2, 256  ;;  %p375_p2 = scmp.lt.s32.totalorder %s237_s2, %s237_s2 }
  0x2a   :  { %294 = vmatprep.subr.mxu1 %v149_v3  ;;  %284 = vmatpush3.msra.mxu0 %v63_v2  ;;  %v59_v8 = vld [vmem:[#allocation7] sm:$0xff]  ;;  %p371_p1 = scmp.ne.s32.totalorder %s237_s2, %s370_s7  ;;  %p376_p3 = scmp.lt.s32.totalorder %s370_s7, %s370_s7 }
  0x2b   :  { %295 = vmatpush3.msra.mxu1 %v149_v3  ;;  %285 = vmatprep.subr.mxu0 %v62_v4 }
  0x2c   :  { %296 = vmatprep.subr.mxu1 %v148_v5  ;;  %286 = vmatpush3.msra.mxu0 %v62_v4  ;;  %p377_p4 = por %p376_p3, %p375_p2 }
  0x2d   :  { %297 = vmatpush3.msra.mxu1 %v148_v5  ;;  %287 = vmatprep.subr.mxu0 %v61_v6 }
  0x2e   :  { %298 = vmatprep.subr.mxu1 %v147_v7  ;;  %288 = vmatpush3.msra.mxu0 %v61_v6  ;;  %p378_p5 = pnand %p377_p4, %p371_p1 }
  0x2f   :  { %289 = vmatprep.mubr.msk.f32.mxu0 %vm65_vm0, %v59_v8  ;;  %299 = vmatpush3.msra.mxu1 %v147_v7 }
  0x30   :  { %300 = vmatprep.mubr.msk.f32.mxu1 %vm65_vm0, %v59_v8  ;;  %290 = vmatmul.mubr.msk.f32.vlgmr.msra.gmra.mxu0 %vm65_vm0, %v60_v9 }
  0x31   :  { %301 = vmatmul.mubr.msk.f32.vlgmr.msra.gmra.mxu1 %vm65_vm0, %v60_v9 }
  0xf0   :  { %v291_v10 = vpop.f32.mrf.mxu0 }
  0xf1   :  { %v302_v11 = vpop.f32.mrf.mxu1  ;;  %228 = vst.msk [vmem:[#allocation8 + $0x8] sm:$0xff] %vm226_vm1, %v291_v10 }
  0xf2   :  { %230 = vst.msk [vmem:[#allocation9 + $0x8] sm:$0xff] %vm226_vm1, %v302_v11  ;;  %v138_v12 = vpop.f32.mrf.mxu0 }
  0xf3   :  { %v217_v13 = vpop.f32.mrf.mxu1  ;;  %227 = vst.msk [vmem:[#allocation8] sm:$0xff] %vm226_vm1, %v138_v12 }
  0xf4   :  { %229 = vst.msk [vmem:[#allocation9] sm:$0xff] %vm226_vm1, %v217_v13 }
  0xf5   :  { %381 = shalt.err (!%p378_p5)
}
  0xf6   :  { %242 = dma.vmem_to_hbm [thread:$0]  %s237_s2, 256, %s483_s3, [#allocation4], %s420_s20, %s420_s20, %s421_s21  }
  0xf7   :  { %s390_s10 = scalar_lea.vmem %s249_s6, 256  ;;  %p395_p7 = scmp.lt.s32.totalorder %s249_s6, %s249_s6 }
  0xf8   :  { %p391_p6 = scmp.ne.s32.totalorder %s249_s6, %s390_s10  ;;  %p396_p8 = scmp.lt.s32.totalorder %s390_s10, %s390_s10 }
  0xfa   :  { %p397_p9 = por %p396_p8, %p395_p7 }
  0xfc   :  { %p398_p10 = pnand %p397_p9, %p391_p6 }
  0xfe   :  { %401 = shalt.err (!%p398_p10)
}
  0xff   :  { %254 = dma.vmem_to_hbm [thread:$0]  %s249_s6, 256, %s484_s4, [#allocation10], %s420_s20, %s420_s20, %s421_s21  }
 0x100   :  { %414 = dma.done.wait [#allocation4], 256  }
 0x101   :  { %415 = vsyncadd [#allocation4], 4294967040 }
 0x102   :  { %416 = dma.done.wait [#allocation10], 256  }
 0x103   :  { %417 = vsyncadd [#allocation10], 4294967040 }
 0x104   :  { %261 = vsyncpa [#allocation3], 1 }
 0x105   :  { %262 = vsyncpa [#allocation6], 1 }
 0x106   :  { %263 = vsyncpa [#allocation4], 1 }
 0x107   :  { %264 = vsyncpa [#allocation10], 1 }

</bundles_post_ra>
